<compile_context>
chip_gen: v7x
topology: tpu7x:2x2x1
jax: 0.10.0
libtpu: 0.0.40
codegen_flags: <defaults>
</compile_context>

<pallas_src>
import functools
import math

import jax
import jax.numpy as jnp
from jax import lax
from jax.experimental import pallas as pl
from jax.experimental.pallas import tpu as pltpu


def _round_up(v, m):
    return ((v + m - 1) // m) * m


def _pick_feature_tile(D):
    """Feature-tile width.

    * D not a multiple of 128 -> full-extent block (no pad/slice HBM passes).
    * D a multiple of 128     -> largest 128-multiple divisor of D that is
      <= 1024 and leaves >= 2 feature tiles (megacore work on v7x).
    """
    if D % 128 != 0 or D <= 128:
        return D
    best = 128
    cand = 128
    cap = min(D // 2, 1024)
    while cand <= cap:
        if D % cand == 0:
            best = cand
        cand += 128
    return best


def _pick_batch_tile(B, td):
    # ~2 MiB per (tb, td) f32 tile => double-buffered x + out ~8 MiB resident,
    # safe on v7x (64 MiB physical / 32 MiB scoped) and big enough to amortize
    # per-grid-step overhead on v5e/v6e.
    cap = (2 * 1024 * 1024) // (4 * max(td, 1))
    cap = max(8, min(2048, (cap // 8) * 8))
    return min(_round_up(B, 8), cap)


def _update_kernel(x_ref, mean_ref, var_ref, count_ref,
                   out_ref, new_mean_ref, new_var_ref, new_count_ref,
                   sum_ref, sumsq_ref, inv_std_ref,
                   *, epsilon, batch, tile_rows):
    i = pl.program_id(1)              # batch-tile index (reduction axis, last)
    n_b = pl.num_programs(1)

    @pl.when(i == 0)
    def _():
        sum_ref[...] = jnp.zeros_like(sum_ref)
        sumsq_ref[...] = jnp.zeros_like(sumsq_ref)
        # Hoisted once per feature tile; rsqrt uses the EUP slot.
        inv_std_ref[...] = lax.rsqrt(var_ref[...] + epsilon)

    x = x_ref[...].astype(jnp.float32)        # (tb, td)
    xc = x - mean_ref[...]                    # shifted by OLD running mean

    # ---- normalize with the OLD running stats (reuses the shifted value) ----
    out_ref[...] = (xc * inv_std_ref[...]).astype(out_ref.dtype)

    # ---- shifted one-pass batch statistics (well conditioned) ----
    rem = batch % tile_rows                   # static Python int
    if rem == 0:
        sum_ref[...] += jnp.sum(xc, axis=0, keepdims=True)
        sumsq_ref[...] += jnp.sum(xc * xc, axis=0, keepdims=True)
    else:
        @pl.when(i < n_b - 1)
        def _():
            sum_ref[...] += jnp.sum(xc, axis=0, keepdims=True)
            sumsq_ref[...] += jnp.sum(xc * xc, axis=0, keepdims=True)

        @pl.when(i == n_b - 1)
        def _():
            # Mask only the rows hanging past the real batch (ragged tail).
            row = lax.broadcasted_iota(jnp.int32, (xc.shape[0], 1), 0)
            xm = jnp.where(row < rem, xc, 0.0)
            sum_ref[...] += jnp.sum(xm, axis=0, keepdims=True)
            sumsq_ref[...] += jnp.sum(xm * xm, axis=0, keepdims=True)

    # ---- finalize: Chan/Welford combine with the running stats ----
    # NOTE: new_mean/new_var are aliased onto mean/var; they are only written
    # here, at the last batch step, when the input stat block is VMEM-resident.
    @pl.when(i == n_b - 1)
    def _():
        bc = jnp.float32(batch)
        count = count_ref[0, 0]               # scalar, lives in SMEM
        tot = count + bc
        inv_tot = 1.0 / tot
        inv_bc = 1.0 / bc
        d = sum_ref[...] * inv_bc             # == batch_mean - old_mean
        batch_var = jnp.maximum(sumsq_ref[...] * inv_bc - d * d, 0.0)
        mean = mean_ref[...]
        var = var_ref[...]
        new_mean_ref[...] = mean + d * (bc * inv_tot)
        m2 = var * count + batch_var * bc + (d * d) * (count * bc * inv_tot)
        new_var_ref[...] = m2 * inv_tot
        new_count_ref[0, 0] = tot


def _eval_kernel(x_ref, mean_ref, var_ref, out_ref, *, epsilon):
    inv_std = lax.rsqrt(var_ref[...] + epsilon)
    x = x_ref[...].astype(jnp.float32)
    out_ref[...] = ((x - mean_ref[...]) * inv_std).astype(out_ref.dtype)


def running_norm_forward(x, running_mean, running_var, count,
                         epsilon=1e-5, update=True, training=True):
    """JAX/Pallas equivalent of RunningNorm.forward for x of shape (B, *shape).

    Returns (out, new_mean, new_var, new_count).  Stats are passed through
    unchanged when update/training is False.
    """
    B = x.shape[0]
    feat_shape = x.shape[1:]
    D = int(math.prod(feat_shape)) if feat_shape else 1

    # Plain reshapes only (metadata-level): no pad/slice HBM passes.
    x2 = x.reshape(B, D)
    mean2 = running_mean.astype(jnp.float32).reshape(1, D)
    var2 = running_var.astype(jnp.float32).reshape(1, D)

    td = _pick_feature_tile(D)
    tb = _pick_batch_tile(B, td)
    n_d = pl.cdiv(D, td)                      # td divides D (or td == D)
    n_b = pl.cdiv(B, tb)

    x_spec = pl.BlockSpec((tb, td), lambda j, i: (i, j))
    stat_spec = pl.BlockSpec((1, td), lambda j, i: (0, j))
    smem_spec = pl.BlockSpec(memory_space=pltpu.MemorySpace.SMEM)

    if not (update and training):
        out2 = pl.pallas_call(
            functools.partial(_eval_kernel, epsilon=float(epsilon)),
            out_shape=jax.ShapeDtypeStruct((B, D), x.dtype),
            grid_spec=pltpu.PrefetchScalarGridSpec(
                num_scalar_prefetch=0,
                grid=(n_d, n_b),
                in_specs=[x_spec, stat_spec, stat_spec],
                out_specs=x_spec),
            compiler_params=pltpu.CompilerParams(
                dimension_semantics=("parallel", "parallel"),
                vmem_limit_bytes=32 * 1024 * 1024),
        )(x2, mean2, var2)
        return out2.reshape(x.shape), running_mean, running_var, count

    count_2d = jnp.full((1, 1), count, jnp.float32)
    kernel = functools.partial(_update_kernel, epsilon=float(epsilon),
                               batch=B, tile_rows=tb)
    out_shapes = (
        jax.ShapeDtypeStruct((B, D), x.dtype),        # out
        jax.ShapeDtypeStruct((1, D), jnp.float32),    # new_mean
        jax.ShapeDtypeStruct((1, D), jnp.float32),    # new_var
        jax.ShapeDtypeStruct((1, 1), jnp.float32),    # new_count
    )
    out2, new_mean2, new_var2, new_count = pl.pallas_call(
        kernel,
        out_shape=out_shapes,
        grid_spec=pltpu.PrefetchScalarGridSpec(
            num_scalar_prefetch=0,
            grid=(n_d, n_b),              # feature (parallel), batch reduction last
            in_specs=[x_spec, stat_spec, stat_spec, smem_spec],
            out_specs=(x_spec, stat_spec, stat_spec, smem_spec),
            scratch_shapes=[pltpu.VMEM((1, td), jnp.float32),    # sum(x - m_old)
                            pltpu.VMEM((1, td), jnp.float32),    # sum((x-m_old)^2)
                            pltpu.VMEM((1, td), jnp.float32)]),  # inv_std
        compiler_params=pltpu.CompilerParams(
            dimension_semantics=("parallel", "arbitrary"),
            vmem_limit_bytes=32 * 1024 * 1024),
        # mean -> new_mean, var -> new_var (tiny (1, D) buffers; see note in
        # the kernel about write ordering making this safe).
        input_output_aliases={1: 1, 2: 2},
    )(x2, mean2, var2, count_2d)

    new_mean = new_mean2.reshape(feat_shape)
    new_var = new_var2.reshape(feat_shape)
    return out2.reshape(x.shape), new_mean, new_var, new_count.reshape(())


def _reference(x, mean, var, count, epsilon=1e-5):
    out = (x - mean) / jnp.sqrt(var + epsilon)
    bm = x.mean(0)
    bv = ((x - bm) ** 2).mean(0)
    bc = x.shape[0]
    delta = bm - mean
    tot = count + bc
    new_mean = mean + delta * bc / tot
    m2 = var * count + bv * bc + delta ** 2 * count * bc / tot
    return out, new_mean, m2 / tot, tot


def _run_case(key, B, D, eps=1e-5):
    kx, km, kv = jax.random.split(key, 3)
    x = jax.random.normal(kx, (B, D), dtype=jnp.float32) * 2.0 + 0.5
    running_mean = jnp.zeros((D,), jnp.float32) + 0.1 * jax.random.normal(km, (D,))
    running_var = jnp.ones((D,), jnp.float32) + 0.05 * jax.random.uniform(kv, (D,))
    count = jnp.float32(1e-4)          # init_eps

    # Reference computed before the kernel calls.
    ref_out, ref_mean, ref_var, ref_count = _reference(
        x, running_mean, running_var, count, eps)

    # Training-mode forward: normalize with old stats + update running stats.
    out, new_mean, new_var, new_count = running_norm_forward(
        x, running_mean, running_var, count, epsilon=eps,
        update=True, training=True)
    jax.block_until_ready((out, new_mean, new_var, new_count))

    assert jnp.allclose(out, ref_out, atol=1e-5, rtol=1e-5)
    assert jnp.allclose(new_mean, ref_mean, atol=1e-5, rtol=1e-5)
    assert jnp.allclose(new_var, ref_var, atol=1e-5, rtol=1e-5)
    assert jnp.allclose(new_count, ref_count, atol=1e-5, rtol=1e-5)

    # Eval-mode forward: normalize only, stats passed through untouched.
    out_eval, m_same, v_same, c_same = running_norm_forward(
        x, running_mean, running_var, count, epsilon=eps,
        update=True, training=False)
    jax.block_until_ready(out_eval)
    assert jnp.allclose(out_eval, ref_out, atol=1e-5, rtol=1e-5)
    assert m_same is running_mean and v_same is running_var and c_same is count


if __name__ == "__main__":
    key = jax.random.PRNGKey(0)
    k1, k2 = jax.random.split(key)

    # Case 1: RunningNorm((32,)), batch 8 — D not a multiple of 128
    # (full-D feature block path, no pad/slice, exact batch tiling).
    _run_case(k1, B=8, D=32)

    # Case 2: D = 256 (two 128-wide feature tiles => >=2 parallel tiles for
    # v7x megacore) with B = 20 (ragged last batch tile => masked stats path).
    _run_case(k2, B=20, D=256)

    print("KERNEL_OK")
</pallas_src>

<mosaic_0001>
module attributes {stable_mosaic.version = 11 : i64} {
  func.func @_update_kernel(%arg0: i32, %arg1: i32, %arg2: memref<8x32xf32, #tpu.memory_space<vmem>>, %arg3: memref<1x32xf32, #tpu.memory_space<vmem>>, %arg4: memref<1x32xf32, #tpu.memory_space<vmem>>, %arg5: memref<1x1xf32, #tpu.memory_space<smem>>, %arg6: memref<8x32xf32, #tpu.memory_space<vmem>>, %arg7: memref<1x32xf32, #tpu.memory_space<vmem>>, %arg8: memref<1x32xf32, #tpu.memory_space<vmem>>, %arg9: memref<1x1xf32, #tpu.memory_space<smem>>, %arg10: memref<1x32xf32, #tpu.memory_space<vmem>>, %arg11: memref<1x32xf32, #tpu.memory_space<vmem>>, %arg12: memref<1x32xf32, #tpu.memory_space<vmem>>) attributes {dimension_semantics = [#tpu.dimension_semantics<parallel>, #tpu.dimension_semantics<arbitrary>], iteration_bounds = array<i64: 1, 1>, scalar_prefetch = 0 : i64, scratch_operands = 3 : i64, tpu.core_type = #tpu.core_type<tc>, window_params = [{transform_indices = @transform_0, window_bounds = array<i64: 8, 32>}, {transform_indices = @transform_1, window_bounds = array<i64: 1, 32>}, {transform_indices = @transform_2, window_bounds = array<i64: 1, 32>}, {transform_indices = @transform_3, window_bounds = array<i64: 1, 1>}, {transform_indices = @transform_4, window_bounds = array<i64: 8, 32>}, {transform_indices = @transform_5, window_bounds = array<i64: 1, 32>}, {transform_indices = @transform_6, window_bounds = array<i64: 1, 32>}, {transform_indices = @transform_7, window_bounds = array<i64: 1, 1>}]} {
    %c0_i32 = arith.constant 0 : i32
    %0 = arith.cmpi eq, %arg1, %c0_i32 : i32
    %1 = arith.extui %0 : i1 to i32
    %c0_i32_0 = arith.constant 0 : i32
    %2 = arith.cmpi ne, %1, %c0_i32_0 : i32
    scf.if %2 {
      %cst_19 = arith.constant 0.000000e+00 : f32
      %25 = vector.broadcast %cst_19 : f32 to vector<1x32xf32>
      %c0_20 = arith.constant 0 : index
      %c0_21 = arith.constant 0 : index
      %26 = vector.load %arg10[%c0_20, %c0_21] : memref<1x32xf32, #tpu.memory_space<vmem>>, vector<1x32xf32>
      tpu.vector_store %arg10[%c0_20, %c0_21], %25 {strides = array<i32>} : memref<1x32xf32, #tpu.memory_space<vmem>>, vector<1x32xf32>,
      %cst_22 = arith.constant 0.000000e+00 : f32
      %27 = vector.broadcast %cst_22 : f32 to vector<1x32xf32>
      %c0_23 = arith.constant 0 : index
      %c0_24 = arith.constant 0 : index
      %28 = vector.load %arg11[%c0_23, %c0_24] : memref<1x32xf32, #tpu.memory_space<vmem>>, vector<1x32xf32>
      tpu.vector_store %arg11[%c0_23, %c0_24], %27 {strides = array<i32>} : memref<1x32xf32, #tpu.memory_space<vmem>>, vector<1x32xf32>,
      %c0_25 = arith.constant 0 : index
      %c0_26 = arith.constant 0 : index
      %29 = vector.load %arg4[%c0_25, %c0_26] : memref<1x32xf32, #tpu.memory_space<vmem>>, vector<1x32xf32>
      %cst_27 = arith.constant 9.99999974E-6 : f32
      %30 = vector.broadcast %cst_27 : f32 to vector<1x32xf32>
      %31 = arith.addf %29, %30 : vector<1x32xf32>
      %32 = math.rsqrt %31 : vector<1x32xf32>
      %c0_28 = arith.constant 0 : index
      %c0_29 = arith.constant 0 : index
      %33 = vector.load %arg12[%c0_28, %c0_29] : memref<1x32xf32, #tpu.memory_space<vmem>>, vector<1x32xf32>
      tpu.vector_store %arg12[%c0_28, %c0_29], %32 {strides = array<i32>} : memref<1x32xf32, #tpu.memory_space<vmem>>, vector<1x32xf32>,
    } else {
    }
    %c0 = arith.constant 0 : index
    %c0_1 = arith.constant 0 : index
    %3 = vector.load %arg2[%c0, %c0_1] : memref<8x32xf32, #tpu.memory_space<vmem>>, vector<8x32xf32>
    %c0_2 = arith.constant 0 : index
    %c0_3 = arith.constant 0 : index
    %4 = vector.load %arg3[%c0_2, %c0_3] : memref<1x32xf32, #tpu.memory_space<vmem>>, vector<1x32xf32>
    %5 = vector.broadcast %4 : vector<1x32xf32> to vector<8x32xf32>
    %6 = arith.subf %3, %5 : vector<8x32xf32>
    %c0_4 = arith.constant 0 : index
    %c0_5 = arith.constant 0 : index
    %7 = vector.load %arg12[%c0_4, %c0_5] : memref<1x32xf32, #tpu.memory_space<vmem>>, vector<1x32xf32>
    %8 = vector.broadcast %7 : vector<1x32xf32> to vector<8x32xf32>
    %9 = arith.mulf %6, %8 : vector<8x32xf32>
    %c0_6 = arith.constant 0 : index
    %c0_7 = arith.constant 0 : index
    %10 = vector.load %arg6[%c0_6, %c0_7] : memref<8x32xf32, #tpu.memory_space<vmem>>, vector<8x32xf32>
    tpu.vector_store %arg6[%c0_6, %c0_7], %9 {strides = array<i32>} : memref<8x32xf32, #tpu.memory_space<vmem>>, vector<8x32xf32>,
    %c0_8 = arith.constant 0 : index
    %c0_9 = arith.constant 0 : index
    %11 = vector.load %arg10[%c0_8, %c0_9] : memref<1x32xf32, #tpu.memory_space<vmem>>, vector<1x32xf32>
    %cst = arith.constant dense<0.000000e+00> : vector<32xf32>
    %12 = vector.multi_reduction <add>, %6, %cst [0] : vector<8x32xf32> to vector<32xf32>
    %13 = vector.shape_cast %12 : vector<32xf32> to vector<1x32xf32>
    %14 = arith.addf %11, %13 : vector<1x32xf32>
    %c0_10 = arith.constant 0 : index
    %c0_11 = arith.constant 0 : index
    %15 = vector.load %arg10[%c0_10, %c0_11] : memref<1x32xf32, #tpu.memory_space<vmem>>, vector<1x32xf32>
    tpu.vector_store %arg10[%c0_10, %c0_11], %14 {strides = array<i32>} : memref<1x32xf32, #tpu.memory_space<vmem>>, vector<1x32xf32>,
    %c0_12 = arith.constant 0 : index
    %c0_13 = arith.constant 0 : index
    %16 = vector.load %arg11[%c0_12, %c0_13] : memref<1x32xf32, #tpu.memory_space<vmem>>, vector<1x32xf32>
    %17 = arith.mulf %6, %6 : vector<8x32xf32>
    %cst_14 = arith.constant dense<0.000000e+00> : vector<32xf32>
    %18 = vector.multi_reduction <add>, %17, %cst_14 [0] : vector<8x32xf32> to vector<32xf32>
    %19 = vector.shape_cast %18 : vector<32xf32> to vector<1x32xf32>
    %20 = arith.addf %16, %19 : vector<1x32xf32>
    %c0_15 = arith.constant 0 : index
    %c0_16 = arith.constant 0 : index
    %21 = vector.load %arg11[%c0_15, %c0_16] : memref<1x32xf32, #tpu.memory_space<vmem>>, vector<1x32xf32>
    tpu.vector_store %arg11[%c0_15, %c0_16], %20 {strides = array<i32>} : memref<1x32xf32, #tpu.memory_space<vmem>>, vector<1x32xf32>,
    %c0_i32_17 = arith.constant 0 : i32
    %22 = arith.cmpi eq, %arg1, %c0_i32_17 : i32
    %23 = arith.extui %22 : i1 to i32
    %c0_i32_18 = arith.constant 0 : i32
    %24 = arith.cmpi ne, %23, %c0_i32_18 : i32
    scf.if %24 {
      %c0_19 = arith.constant 0 : index
      %c0_20 = arith.constant 0 : index
      %25 = memref.load %arg5[%c0_19, %c0_20] : memref<1x1xf32, #tpu.memory_space<smem>>
      %cst_21 = arith.constant 8.000000e+00 : f32
      %26 = arith.addf %25, %cst_21 : f32
      %cst_22 = arith.constant 1.000000e+00 : f32
      %27 = arith.divf %cst_22, %26 : f32
      %cst_23 = arith.constant 1.000000e+00 : f32
      %cst_24 = arith.constant 8.000000e+00 : f32
      %28 = arith.divf %cst_23, %cst_24 : f32
      %c0_25 = arith.constant 0 : index
      %c0_26 = arith.constant 0 : index
      %29 = vector.load %arg10[%c0_25, %c0_26] : memref<1x32xf32, #tpu.memory_space<vmem>>, vector<1x32xf32>
      %30 = vector.broadcast %28 : f32 to vector<1x32xf32>
      %31 = arith.mulf %29, %30 : vector<1x32xf32>
      %c0_27 = arith.constant 0 : index
      %c0_28 = arith.constant 0 : index
      %32 = vector.load %arg11[%c0_27, %c0_28] : memref<1x32xf32, #tpu.memory_space<vmem>>, vector<1x32xf32>
      %33 = vector.broadcast %28 : f32 to vector<1x32xf32>
      %34 = arith.mulf %32, %33 : vector<1x32xf32>
      %35 = arith.mulf %31, %31 : vector<1x32xf32>
      %36 = arith.subf %34, %35 : vector<1x32xf32>
      %cst_29 = arith.constant 0.000000e+00 : f32
      %37 = vector.broadcast %cst_29 : f32 to vector<1x32xf32>
      %38 = arith.maximumf %36, %37 : vector<1x32xf32>
      %c0_30 = arith.constant 0 : index
      %c0_31 = arith.constant 0 : index
      %39 = vector.load %arg3[%c0_30, %c0_31] : memref<1x32xf32, #tpu.memory_space<vmem>>, vector<1x32xf32>
      %c0_32 = arith.constant 0 : index
      %c0_33 = arith.constant 0 : index
      %40 = vector.load %arg4[%c0_32, %c0_33] : memref<1x32xf32, #tpu.memory_space<vmem>>, vector<1x32xf32>
      %cst_34 = arith.constant 8.000000e+00 : f32
      %41 = arith.mulf %cst_34, %27 : f32
      %42 = vector.broadcast %41 : f32 to vector<1x32xf32>
      %43 = arith.mulf %31, %42 : vector<1x32xf32>
      %44 = arith.addf %39, %43 : vector<1x32xf32>
      %c0_35 = arith.constant 0 : index
      %c0_36 = arith.constant 0 : index
      %45 = vector.load %arg7[%c0_35, %c0_36] : memref<1x32xf32, #tpu.memory_space<vmem>>, vector<1x32xf32>
      tpu.vector_store %arg7[%c0_35, %c0_36], %44 {strides = array<i32>} : memref<1x32xf32, #tpu.memory_space<vmem>>, vector<1x32xf32>,
      %46 = vector.broadcast %25 : f32 to vector<1x32xf32>
      %47 = arith.mulf %40, %46 : vector<1x32xf32>
      %cst_37 = arith.constant 8.000000e+00 : f32
      %48 = vector.broadcast %cst_37 : f32 to vector<1x32xf32>
      %49 = arith.mulf %38, %48 : vector<1x32xf32>
      %50 = arith.addf %47, %49 : vector<1x32xf32>
      %51 = arith.mulf %31, %31 : vector<1x32xf32>
      %cst_38 = arith.constant 8.000000e+00 : f32
      %52 = arith.mulf %25, %cst_38 : f32
      %53 = arith.mulf %52, %27 : f32
      %54 = vector.broadcast %53 : f32 to vector<1x32xf32>
      %55 = arith.mulf %51, %54 : vector<1x32xf32>
      %56 = arith.addf %50, %55 : vector<1x32xf32>
      %57 = vector.broadcast %27 : f32 to vector<1x32xf32>
      %58 = arith.mulf %56, %57 : vector<1x32xf32>
      %c0_39 = arith.constant 0 : index
      %c0_40 = arith.constant 0 : index
      %59 = vector.load %arg8[%c0_39, %c0_40] : memref<1x32xf32, #tpu.memory_space<vmem>>, vector<1x32xf32>
      tpu.vector_store %arg8[%c0_39, %c0_40], %58 {strides = array<i32>} : memref<1x32xf32, #tpu.memory_space<vmem>>, vector<1x32xf32>,
      %c0_41 = arith.constant 0 : index
      %c0_42 = arith.constant 0 : index
      %60 = memref.load %arg9[%c0_41, %c0_42] : memref<1x1xf32, #tpu.memory_space<smem>>
      memref.store %26, %arg9[%c0_41, %c0_42] : memref<1x1xf32, #tpu.memory_space<smem>>
    } else {
    }
    return
  }
  func.func @transform_0(%arg0: i32, %arg1: i32) -> (i32, i32) {
    %c0_i32 = arith.constant 0 : i32
    return %arg1, %arg0 : i32, i32
  }
  func.func @transform_1(%arg0: i32, %arg1: i32) -> (i32, i32) {
    %c0_i32 = arith.constant 0 : i32
    %c0_i32_0 = arith.constant 0 : i32
    return %c0_i32, %arg0 : i32, i32
  }
  func.func @transform_2(%arg0: i32, %arg1: i32) -> (i32, i32) {
    %c0_i32 = arith.constant 0 : i32
    %c0_i32_0 = arith.constant 0 : i32
    return %c0_i32, %arg0 : i32, i32
  }
  func.func @transform_3(%arg0: i32, %arg1: i32) -> (i32, i32) {
    %c0_i32 = arith.constant 0 : i32
    %c0_i32_0 = arith.constant 0 : i32
    %c0_i32_1 = arith.constant 0 : i32
    return %c0_i32, %c0_i32_0 : i32, i32
  }
  func.func @transform_4(%arg0: i32, %arg1: i32) -> (i32, i32) {
    %c0_i32 = arith.constant 0 : i32
    return %arg1, %arg0 : i32, i32
  }
  func.func @transform_5(%arg0: i32, %arg1: i32) -> (i32, i32) {
    %c0_i32 = arith.constant 0 : i32
    %c0_i32_0 = arith.constant 0 : i32
    return %c0_i32, %arg0 : i32, i32
  }
  func.func @transform_6(%arg0: i32, %arg1: i32) -> (i32, i32) {
    %c0_i32 = arith.constant 0 : i32
    %c0_i32_0 = arith.constant 0 : i32
    return %c0_i32, %arg0 : i32, i32
  }
  func.func @transform_7(%arg0: i32, %arg1: i32) -> (i32, i32) {
    %c0_i32 = arith.constant 0 : i32
    %c0_i32_0 = arith.constant 0 : i32
    %c0_i32_1 = arith.constant 0 : i32
    return %c0_i32, %c0_i32_0 : i32, i32
  }
}

</mosaic_0001>

<bundles_post_ra>
// kernel: tpu_custom_call.1
= control target key start
LH: loop header
LB: loop body
LE: loop exit
PB: predicated region body
PF: predicated region fallthrough
CT: control target
= control target key end

     0   :  { %14 = vsyncpa [#allocation7], 0  ;;  %s487_s0 = inlined_call_operand.vmem [shape: f32[8,32], index: 0, kind: input, shape index: {}]   ;;  %s488_s1 = inlined_call_operand.hbm [shape: f32[1,32], index: 1, kind: input, shape index: {}, may-alias: {1,5}]   ;;  %s489_s2 = inlined_call_operand.hbm [shape: f32[1,32], index: 2, kind: input, shape index: {}, may-alias: {2,6}]   ;;  %s490_s3 = inlined_call_operand.<no memory space> [shape: f32[1,1], index: 3, kind: input, shape index: {}]   ;;  %s491_s4 = inlined_call_operand.hbm [shape: f32[8,32], index: 4, kind: output, shape index: {0}]   ;;  %s492_s5 = inlined_call_operand.hbm [shape: f32[1,32], index: 5, kind: output, shape index: {1}, may-alias: {1,5}]   ;;  %s493_s6 = inlined_call_operand.hbm [shape: f32[1,32], index: 6, kind: output, shape index: {2}, may-alias: {2,6}]   ;;  %s494_s7 = inlined_call_operand.hbm [shape: f32[1,1], index: 7, kind: output, shape index: {3}]  }
   0x1   :  { %15 = vsyncpa [#allocation11], 0 }
   0x2   :  { %16 = vsyncpa [#allocation8], 0 }
   0x3   :  { %17 = vsyncpa [#allocation14], 0 }
   0x4   :  { %18 = vsyncpa [#allocation9], 0  ;;  %s338_s24 = smov [#allocation6]   ;;  %s339_s26 = smov [#allocation10]  }
   0x5   :  { %s27_s25 = sshll.u32 %s338_s24, 4  ;;  %s37_s27 = sshll.u32 %s339_s26, 4  ;;  %s28_s25 = int_to_ptr.vmem [resolvable:$true] %s27_s25  ;;  %s38_s27 = int_to_ptr.vmem [resolvable:$true] %s37_s27 }
   0x6   :  { %s208_s30 = scalar_lea.hbm %s488_s1, 16 }
   0x7   :  { %p209_p0 = scmp.ne.s32.totalorder %s488_s1, %s208_s30  ;;  %p212_p1 = scmp.lt.u32.totalorder %s208_s30, %s488_s1 }
   0x9   :  { %p214_p2 = pnand %p212_p1, %p209_p0 }
   0xb   :  { %217 = shalt.err (!%p214_p2)
}
   0xc   :  { %s218_s12 = scalar_lea.vmem %s28_s25, 16  ;;  %s222_s13 = scalar_lea.vmem %s28_s25, 32 }
   0xd   :  { %p219_p3 = scmp.ne.s32.totalorder %s28_s25, %s218_s12  ;;  %p223_p4 = scmp.lt.s32.totalorder %s28_s25, %s28_s25 }
   0xe   :  { %p224_p5 = scmp.lt.s32.totalorder %s222_s13, %s218_s12 }
  0x10   :  { %p225_p6 = por %p224_p5, %p223_p4 }
  0x12   :  { %p226_p7 = pnand %p225_p6, %p219_p3 }
  0x14   :  { %229 = shalt.err (!%p226_p7)
}
  0x15   :  { %30 = dma.hbm_to_vmem [thread:$0]  %s488_s1, 16, %s28_s25, [#allocation7]  }
  0x16   :  { %s230_s18 = scalar_lea.hbm %s489_s2, 16 }
  0x17   :  { %p231_p8 = scmp.ne.s32.totalorder %s489_s2, %s230_s18  ;;  %p234_p9 = scmp.lt.u32.totalorder %s230_s18, %s489_s2 }
  0x19   :  { %p236_p10 = pnand %p234_p9, %p231_p8 }
  0x1b   :  { %239 = shalt.err (!%p236_p10)
}
  0x1c   :  { %s240_s23 = scalar_lea.vmem %s38_s27, 16  ;;  %s244_s24 = scalar_lea.vmem %s38_s27, 32 }
  0x1d   :  { %p241_p11 = scmp.ne.s32.totalorder %s38_s27, %s240_s23  ;;  %p245_p12 = scmp.lt.s32.totalorder %s38_s27, %s38_s27 }
  0x1e   :  { %p246_p13 = scmp.lt.s32.totalorder %s244_s24, %s240_s23 }
  0x20   :  { %p247_p0 = por %p246_p13, %p245_p12 }
  0x22   :  { %p248_p1 = pnand %p247_p0, %p241_p11 }
  0x24   :  { %251 = shalt.err (!%p248_p1)
}
  0x25   :  { %40 = dma.hbm_to_vmem [thread:$0]  %s489_s2, 16, %s38_s27, [#allocation11]  }
  0x26   :  { %328 = dma.done.wait [#allocation7], 16  }
  0x27   :  { %329 = vsyncadd [#allocation7], 4294967280  ;;  %s105_s29 = sadd.f32 8.0, %s490_s3 }
  0x28   :  { %330 = dma.done.wait [#allocation11], 16  }
  0x29   :  { %331 = vsyncadd [#allocation11], 4294967280  ;;  %vm53_vm0 = vcmask 253952   ;;  %v340_v0 = vmov 0.0   ;;  %v106_v1 = vstv %s105_s29  ;;  %136 = sst [smem:[#allocation16]] %s105_s29  ;;  %v60_v2 = vld [vmem:[%s487_s0] sm:$0xff] }
  0x2a   :  { %54 = vst.msk [vmem:[#allocation2] sm:$0x1] %vm53_vm0, %v340_v0  ;;  %55 = vst.msk [vmem:[#allocation3] sm:$0x1] %vm53_vm0, %v340_v0  ;;  %204 = vrcp.f32 %v106_v1  ;;  %v193_v3 = vld [vmem:[#allocation6] ss:$0 sm:$0xff] }
  0x2b   :  { %vm77_vm1 = vcmask 261120   ;;  %v68_v4 = vsub.f32 %v60_v2, %v193_v3  ;;  %v56_v5 = vld [vmem:[#allocation10] sm:$0x1]  ;;  %s252_s9 = scalar_lea.hbm %s494_s7, 16 }
  0x2c   :  { %p253_p2 = scmp.ne.s32.totalorder %s494_s7, %s252_s9  ;;  %p256_p3 = scmp.lt.u32.totalorder %s252_s9, %s494_s7 }
  0x2e   :  { %p258_p4 = pnand %p256_p3, %p253_p2 }
  0x30   :  { %261 = shalt.err (!%p258_p4)
}
  0x31   :  { %s341_s14 = smov [#allocation16]   ;;  %v80_v6 = vsel %vm77_vm1, %v68_v4, 0.0  ;;  %v91_v7 = vmul.f32 %v68_v4, %v68_v4  ;;  %v57_v8 = vadd.f32 1e-05, %v56_v5  ;;  %v79_v20 = vld [vmem:[#allocation2] sm:$0x1] }
  0x32   :  { %174 = dma.smem_to_hbm %s341_s14, 16, %s494_s7, [#allocation9]   ;;  %v81_v9 = vrot.slane %v80_v6, 4  ;;  %v90_v24 = vld [vmem:[#allocation3] sm:$0x1] }
  0x33   :  { %v92_v10 = vsel %vm77_vm1, %v91_v7, 0.0  ;;  %206 = vrsqrt.f32 %v57_v8  ;;  %s342_s7 = smov [#allocation12]  }
  0x34   :  { %v205_v11 = vpop.eup %204  ;;  %v82_v12 = vadd.f32 %v81_v9, %v80_v6  ;;  %v93_v13 = vrot.slane %v92_v10, 4  ;;  %s143_s16 = sshll.u32 %s342_s7, 4  ;;  %s144_s16 = int_to_ptr.vmem [resolvable:$true] %s143_s16 }
  0x35   :  { %195 = vpush %v205_v11  ;;  %s262_s17 = scalar_lea.vmem %s144_s16, 128  ;;  %p267_p6 = scmp.lt.s32.totalorder %s144_s16, %s144_s16 }
  0x36   :  { %v83_v14 = vrot.slane %v82_v12, 2  ;;  %v94_v15 = vadd.f32 %v93_v13, %v92_v10  ;;  %p263_p5 = scmp.ne.s32.totalorder %s144_s16, %s262_s17  ;;  %p268_p7 = scmp.lt.s32.totalorder %s262_s17, %s262_s17 }
  0x38   :  { %v84_v16 = vadd.f32 %v83_v14, %v82_v12  ;;  %v95_v17 = vrot.slane %v94_v15, 2  ;;  %p269_p8 = por %p268_p7, %p267_p6 }
  0x3a   :  { %v85_v18 = vrot.slane %v84_v16, 1  ;;  %v96_v19 = vadd.f32 %v95_v17, %v94_v15  ;;  %p270_p9 = pnand %p269_p8, %p263_p5 }
  0x3c   :  { %v86_v21 = vadd.f32 %v85_v18, %v84_v16  ;;  %v97_v22 = vrot.slane %v96_v19, 1 }
  0x3d   :  { %v207_v23 = vpop.eup %206 }
  0x3e   :  { %v87_v25 = vadd.f32 %v86_v21, %v79_v20  ;;  %v98_v26 = vadd.f32 %v97_v22, %v96_v19  ;;  %59 = vst.msk [vmem:[#allocation4] sm:$0x1] %vm53_vm0, %v207_v23 }
  0x40   :  { %89 = vst.msk [vmem:[#allocation2] sm:$0x1] %vm53_vm0, %v87_v25  ;;  %v99_v27 = vadd.f32 %v98_v26, %v90_v24 }
  0x42   :  { %100 = vst.msk [vmem:[#allocation3] sm:$0x1] %vm53_vm0, %v99_v27 }
  0x45   :  { %v194_v28 = vld [vmem:[#allocation4] ss:$0 sm:$0xff] }
  0x46   :  { %v76_v29 = vmul.f32 %v194_v28, %v68_v4 }
  0x48   :  { %78 = vst.msk [vmem:[#allocation12] sm:$0xff] %vm77_vm1, %v76_v29 }
  0x49   :  { %273 = shalt.err (!%p270_p9)
}
  0x4a   :  { %s274_s20 = scalar_lea.hbm %s491_s4, 128 }
  0x4b   :  { %p275_p10 = scmp.ne.s32.totalorder %s491_s4, %s274_s20  ;;  %p278_p11 = scmp.lt.u32.totalorder %s274_s20, %s491_s4 }
  0x4d   :  { %p280_p12 = pnand %p278_p11, %p275_p10 }
  0x4f   :  { %283 = shalt.err (!%p280_p12)
}
  0x50   :  { %146 = dma.vmem_to_hbm [thread:$0]  %s144_s16, 128, %s491_s4, [#allocation8]   ;;  %v109_v30 = vld [vmem:[#allocation2] sm:$0x1]  ;;  %v111_v32 = vld [vmem:[#allocation3] sm:$0x1]  ;;  %v123_v38 = vstv %s490_s3 }
  0x51   :  { %v110_v31 = vmul.f32 0.125, %v109_v30  ;;  %v112_v33 = vmul.f32 0.125, %v111_v32  ;;  %v117_v37 = vld [vmem:[#allocation10] sm:$0x1]  ;;  %s127_s8 = smul.f32 8.0, %s490_s3  ;;  %s343_s9 = smov [#allocation13]  }
  0x52   :  { %v124_v39 = vmul.f32 %v123_v38, %v117_v37  ;;  %v116_v41 = vld [vmem:[#allocation6] sm:$0x1]  ;;  %s153_s10 = sshll.u32 %s343_s9, 4  ;;  %s344_s11 = smov [#allocation15]   ;;  %s154_s10 = int_to_ptr.vmem [resolvable:$true] %s153_s10 }
  0x53   :  { %v113_v34 = vmul.f32 %v110_v31, %v110_v31  ;;  %s163_s12 = sshll.u32 %s344_s11, 4  ;;  %s284_s3 = scalar_lea.vmem %s154_s10, 16  ;;  %s454_s12 = int_to_ptr.vmem [resolvable:$true] %s163_s12 }
  0x54   :  { %p285_p13 = scmp.ne.s32.totalorder %s154_s10, %s284_s3  ;;  %s288_s13 = scalar_lea.vmem %s154_s10, 32 }
  0x55   :  { %v114_v35 = vsub.f32 %v112_v33, %v113_v34  ;;  %p289_p0 = scmp.lt.s32.totalorder %s154_s10, %s154_s10  ;;  %p290_p1 = scmp.lt.s32.totalorder %s288_s13, %s284_s3 }
  0x57   :  { %v115_v36 = vmax.f32 %v114_v35, 0.0  ;;  %p291_p2 = por %p290_p1, %p289_p0 }
  0x59   :  { %v125_v40 = vmul.f32 8.0, %v115_v36  ;;  %p292_p3 = pnand %p291_p2, %p285_p13 }
  0x5b   :  { %v126_v43 = vadd.f32 %v125_v40, %v124_v39 }
  0x66   :  { %s196_s2 = spop %195 }
  0x67   :  { %s118_s4 = smul.f32 8.0, %s196_s2  ;;  %v132_v49 = vstv %s196_s2 }
  0x68   :  { %s128_s27 = smul.f32 %s196_s2, %s127_s8 }
  0x69   :  { %v119_v42 = vstv %s118_s4 }
  0x6a   :  { %v120_v44 = vmul.f32 %v119_v42, %v110_v31  ;;  %v129_v45 = vstv %s128_s27 }
  0x6b   :  { %v130_v46 = vmul.f32 %v129_v45, %v113_v34 }
  0x6c   :  { %v121_v47 = vadd.f32 %v120_v44, %v116_v41 }
  0x6d   :  { %v131_v48 = vadd.f32 %v130_v46, %v126_v43 }
  0x6e   :  { %122 = vst.msk [vmem:[#allocation13] sm:$0x1] %vm53_vm0, %v121_v47 }
  0x6f   :  { %v133_v50 = vmul.f32 %v132_v49, %v131_v48 }
  0x70   :  { %295 = shalt.err (!%p292_p3)
}
  0x71   :  { %s296_s15 = scalar_lea.hbm %s492_s5, 16 }
  0x72   :  { %p297_p4 = scmp.ne.s32.totalorder %s492_s5, %s296_s15  ;;  %p300_p5 = scmp.lt.u32.totalorder %s296_s15, %s492_s5 }
  0x74   :  { %p302_p6 = pnand %p300_p5, %p297_p4 }
  0x76   :  { %305 = shalt.err (!%p302_p6)
}
  0x77   :  { %156 = dma.vmem_to_hbm [thread:$0]  %s154_s10, 16, %s492_s5, [#allocation14]   ;;  %134 = vst.msk [vmem:[#allocation15] sm:$0x1] %vm53_vm0, %v133_v50 }
  0x78   :  { %s306_s21 = scalar_lea.vmem %s454_s12, 16  ;;  %s310_s22 = scalar_lea.vmem %s454_s12, 32 }
  0x79   :  { %p307_p7 = scmp.ne.s32.totalorder %s454_s12, %s306_s21  ;;  %p311_p8 = scmp.lt.s32.totalorder %s454_s12, %s454_s12 }
  0x7a   :  { %p312_p9 = scmp.lt.s32.totalorder %s310_s22, %s306_s21 }
  0x7c   :  { %p313_p10 = por %p312_p9, %p311_p8 }
  0x7e   :  { %p314_p11 = pnand %p313_p10, %p307_p7 }
  0x80   :  { %317 = shalt.err (!%p314_p11)
}
  0x81   :  { %s318_s1 = scalar_lea.hbm %s493_s6, 16 }
  0x82   :  { %p319_p12 = scmp.ne.s32.totalorder %s493_s6, %s318_s1  ;;  %p322_p13 = scmp.lt.u32.totalorder %s318_s1, %s493_s6 }
  0x84   :  { %p324_p0 = pnand %p322_p13, %p319_p12 }
  0x86   :  { %327 = shalt.err (!%p324_p0)
}
  0x87   :  { %166 = dma.vmem_to_hbm [thread:$0]  %s454_s12, 16, %s493_s6, [#allocation14]  }
  0x88   :  { %332 = dma.done.wait [#allocation8], 128  }
  0x89   :  { %333 = vsyncadd [#allocation8], 4294967168 }
  0x8a   :  { %334 = dma.done.wait [#allocation14], 32  }
  0x8b   :  { %335 = vsyncadd [#allocation14], 4294967264 }
  0x8c   :  { %336 = dma.done.wait [#allocation9], 16  }
  0x8d   :  { %337 = vsyncadd [#allocation9], 4294967280 }
  0x8e   :  { %187 = sfence }
  0x8f   :  { %188 = vsyncpa [#allocation7], 1 }
  0x90   :  { %189 = vsyncpa [#allocation11], 1 }
  0x91   :  { %190 = vsyncpa [#allocation8], 1 }
  0x92   :  { %191 = vsyncpa [#allocation14], 1 }
  0x93   :  { %192 = vsyncpa [#allocation9], 1 }

</bundles_post_ra>
